<compile_context>
chip_gen: v7x
topology: tpu7x:2x2x1
jax: 0.10.0
libtpu: 0.0.40
codegen_flags: <defaults>
</compile_context>

<pallas_src>
from functools import partial

import jax
import jax.numpy as jnp
from jax.experimental import pallas as pl
from jax.experimental.pallas import tpu as pltpu

# ---- config (synthetic, small) ----
BELIEF_SIZE = 32
STATE_SIZE = 16
HIDDEN_SIZE = 32
ACTION_SIZE = 8
BATCH = 256          # many policy evaluations per call (CEM candidates / envs)

IN_SIZE = BELIEF_SIZE + STATE_SIZE   # 48
LANE = 128                           # padded feature width (lane-dense in/hidden/out)


def policy_kernel(x_ref, w1_ref, w2_ref, w3_ref, bias_ref, out_ref):
    # layer 1: single (tile_m,128) @ (128,128) MXU dot; padded input columns and
    # padded W1 rows are zero, so the math equals cat(B,S) @ W1.
    h = jnp.dot(x_ref[...], w1_ref[...], preferred_element_type=jnp.float32) + bias_ref[0:1, :]
    h = jnp.maximum(h, 0.0)
    # layer 2
    h = jnp.dot(h, w2_ref[...], preferred_element_type=jnp.float32) + bias_ref[1:2, :]
    h = jnp.maximum(h, 0.0)
    # layer 3 + tanh (padded to 128 lanes; real action columns are [:ACTION_SIZE])
    o = jnp.dot(h, w3_ref[...], preferred_element_type=jnp.float32) + bias_ref[2:3, :]
    out_ref[...] = jnp.tanh(o).astype(out_ref.dtype)


def _pad2(x, rows, cols):
    return jnp.zeros((rows, cols), x.dtype).at[: x.shape[0], : x.shape[1]].set(x)


def prepare_params(params):
    """One-time layout plumbing (NOT in the per-call path): pad weights to 128
    lanes and pack the three biases into a single (3, 128) array (one tiny DMA)."""
    w1, b1, w2, b2, w3, b3 = params
    w1p = _pad2(w1, LANE, LANE)   # zero rows beyond IN_SIZE, cols beyond HIDDEN_SIZE
    w2p = _pad2(w2, LANE, LANE)
    w3p = _pad2(w3, LANE, LANE)   # zero cols beyond ACTION_SIZE
    bias = jnp.zeros((3, LANE), jnp.float32)
    bias = bias.at[0, :HIDDEN_SIZE].set(b1.reshape(-1))
    bias = bias.at[1, :HIDDEN_SIZE].set(b2.reshape(-1))
    bias = bias.at[2, :ACTION_SIZE].set(b3.reshape(-1))
    return (w1p, w2p, w3p, bias)


def _num_parallel_blocks():
    """2 parallel blocks on v7x (2 TensorCores/chip), 1 block (single grid step)
    on single-core parts (v5e/v6e) so per-step overhead is paid once."""
    try:
        kind = jax.devices()[0].device_kind.lower()
    except Exception:
        return 1
    return 2 if ("v7" in kind or "7x" in kind) else 1


@partial(jax.jit, static_argnames=("num_blocks",))
def policy_forward(B, S, packed_params, num_blocks=1):
    w1p, w2p, w3p, bias = packed_params
    batch = B.shape[0]

    # Merge B/S and zero-pad to (m_pad, 128) in one fused pad: lane-dense input,
    # one input DMA stream, no in-kernel concat.
    x = jnp.concatenate([B, S], axis=1)
    align = 8 * num_blocks                       # each block's row count must be /8
    m_pad = pl.cdiv(batch, align) * align
    x = jnp.pad(x, ((0, m_pad - batch), (0, LANE - x.shape[1])))

    tile_m = m_pad // num_blocks
    resident = lambda shape: pl.BlockSpec(shape, lambda i: (0, 0))  # VMEM-resident

    out_padded = pl.pallas_call(
        policy_kernel,
        out_shape=jax.ShapeDtypeStruct((m_pad, LANE), jnp.float32),
        grid=(num_blocks,),
        in_specs=[
            pl.BlockSpec((tile_m, LANE), lambda i: (i, 0)),
            resident((LANE, LANE)),
            resident((LANE, LANE)),
            resident((LANE, LANE)),
            resident((3, LANE)),
        ],
        out_specs=pl.BlockSpec((tile_m, LANE), lambda i: (i, 0)),
        compiler_params=pltpu.CompilerParams(
            dimension_semantics=("parallel",)),   # v7x: one block per TensorCore
    )(x, w1p, w2p, w3p, bias)

    # Padded hidden/action lanes are exactly zero; padded batch rows sliced off.
    return out_padded[:batch, :ACTION_SIZE]


def init_params(key):
    # PyTorch nn.Linear stores weight as (out, in); we keep (in, out) so the
    # kernel computes x @ W + b (equivalent to torch's x @ W.T + b).
    k1, k2, k3, k4, k5, k6 = jax.random.split(key, 6)
    w1 = jax.random.normal(k1, (IN_SIZE, HIDDEN_SIZE), jnp.float32) * 0.1
    b1 = jax.random.normal(k2, (1, HIDDEN_SIZE), jnp.float32) * 0.1
    w2 = jax.random.normal(k3, (HIDDEN_SIZE, HIDDEN_SIZE), jnp.float32) * 0.1
    b2 = jax.random.normal(k4, (1, HIDDEN_SIZE), jnp.float32) * 0.1
    w3 = jax.random.normal(k5, (HIDDEN_SIZE, ACTION_SIZE), jnp.float32) * 0.1
    b3 = jax.random.normal(k6, (1, ACTION_SIZE), jnp.float32) * 0.1
    return (w1, b1, w2, b2, w3, b3)


def policy_ref(B, S, params):
    (w1, b1, w2, b2, w3, b3) = params
    x = jnp.concatenate([B, S], axis=1)
    h = jnp.maximum(x @ w1 + b1, 0.0)
    h = jnp.maximum(h @ w2 + b2, 0.0)
    return jnp.tanh(h @ w3 + b3)


if __name__ == "__main__":
    key = jax.random.PRNGKey(0)
    kB, kS, kP = jax.random.split(key, 3)
    B = jax.random.normal(kB, (BATCH, BELIEF_SIZE), jnp.float32)
    S = jax.random.normal(kS, (BATCH, STATE_SIZE), jnp.float32)
    params = init_params(kP)

    # One-time weight packing (kept out of the per-call path / jit cache key).
    packed = jax.block_until_ready(jax.tree_util.tree_map(jnp.asarray, prepare_params(params)))
    num_blocks = _num_parallel_blocks()

    out = jax.block_until_ready(policy_forward(B, S, packed, num_blocks=num_blocks))

    ref = policy_ref(B, S, params)
    assert out.shape == (BATCH, ACTION_SIZE)
    assert jnp.allclose(out, ref, atol=1e-4, rtol=1e-4), float(jnp.max(jnp.abs(out - ref)))
    print("KERNEL_OK")
</pallas_src>

<mosaic_0001>
module attributes {stable_mosaic.version = 11 : i64} {
  func.func @policy_kernel(%arg0: i32, %arg1: memref<256x128xf32, #tpu.memory_space<vmem>>, %arg2: memref<128x128xf32, #tpu.memory_space<vmem>>, %arg3: memref<128x128xf32, #tpu.memory_space<vmem>>, %arg4: memref<128x128xf32, #tpu.memory_space<vmem>>, %arg5: memref<3x128xf32, #tpu.memory_space<vmem>>, %arg6: memref<256x128xf32, #tpu.memory_space<vmem>>) attributes {dimension_semantics = [#tpu.dimension_semantics<parallel>], iteration_bounds = array<i64: 1>, scalar_prefetch = 0 : i64, scratch_operands = 0 : i64, tpu.core_type = #tpu.core_type<tc>, window_params = [{transform_indices = @transform_0, window_bounds = array<i64: 256, 128>}, {pipeline_mode = #tpu.pipeline_mode<synchronous>, transform_indices = @transform_1, window_bounds = array<i64: 128, 128>}, {pipeline_mode = #tpu.pipeline_mode<synchronous>, transform_indices = @transform_2, window_bounds = array<i64: 128, 128>}, {pipeline_mode = #tpu.pipeline_mode<synchronous>, transform_indices = @transform_3, window_bounds = array<i64: 128, 128>}, {pipeline_mode = #tpu.pipeline_mode<synchronous>, transform_indices = @transform_4, window_bounds = array<i64: 3, 128>}, {transform_indices = @transform_5, window_bounds = array<i64: 256, 128>}]} {
    %c0 = arith.constant 0 : index
    %c0_0 = arith.constant 0 : index
    %0 = vector.load %arg1[%c0, %c0_0] : memref<256x128xf32, #tpu.memory_space<vmem>>, vector<256x128xf32>
    %c0_1 = arith.constant 0 : index
    %c0_2 = arith.constant 0 : index
    %1 = vector.load %arg2[%c0_1, %c0_2] : memref<128x128xf32, #tpu.memory_space<vmem>>, vector<128x128xf32>
    %cst = arith.constant dense<0.000000e+00> : vector<256x128xf32>
    %2 = tpu.matmul %0, %1, %cst {dimension_numbers = #tpu.dot_dimension_numbers<[1], [0], [0], [1], [0, 0, 1, 1], [], []>} : vector<256x128xf32>, vector<128x128xf32>, vector<256x128xf32> -> vector<256x128xf32>
    %c0_3 = arith.constant 0 : index
    %c0_4 = arith.constant 0 : index
    %3 = vector.load %arg5[%c0_3, %c0_4] : memref<3x128xf32, #tpu.memory_space<vmem>>, vector<1x128xf32>
    %4 = vector.broadcast %3 : vector<1x128xf32> to vector<256x128xf32>
    %5 = arith.addf %2, %4 : vector<256x128xf32>
    %cst_5 = arith.constant 0.000000e+00 : f32
    %6 = vector.broadcast %cst_5 : f32 to vector<256x128xf32>
    %7 = arith.maximumf %5, %6 : vector<256x128xf32>
    %c0_6 = arith.constant 0 : index
    %c0_7 = arith.constant 0 : index
    %8 = vector.load %arg3[%c0_6, %c0_7] : memref<128x128xf32, #tpu.memory_space<vmem>>, vector<128x128xf32>
    %cst_8 = arith.constant dense<0.000000e+00> : vector<256x128xf32>
    %9 = tpu.matmul %7, %8, %cst_8 {dimension_numbers = #tpu.dot_dimension_numbers<[1], [0], [0], [1], [0, 0, 1, 1], [], []>} : vector<256x128xf32>, vector<128x128xf32>, vector<256x128xf32> -> vector<256x128xf32>
    %c1 = arith.constant 1 : index
    %c0_9 = arith.constant 0 : index
    %10 = vector.load %arg5[%c1, %c0_9] : memref<3x128xf32, #tpu.memory_space<vmem>>, vector<1x128xf32>
    %11 = vector.broadcast %10 : vector<1x128xf32> to vector<256x128xf32>
    %12 = arith.addf %9, %11 : vector<256x128xf32>
    %cst_10 = arith.constant 0.000000e+00 : f32
    %13 = vector.broadcast %cst_10 : f32 to vector<256x128xf32>
    %14 = arith.maximumf %12, %13 : vector<256x128xf32>
    %c0_11 = arith.constant 0 : index
    %c0_12 = arith.constant 0 : index
    %15 = vector.load %arg4[%c0_11, %c0_12] : memref<128x128xf32, #tpu.memory_space<vmem>>, vector<128x128xf32>
    %cst_13 = arith.constant dense<0.000000e+00> : vector<256x128xf32>
    %16 = tpu.matmul %14, %15, %cst_13 {dimension_numbers = #tpu.dot_dimension_numbers<[1], [0], [0], [1], [0, 0, 1, 1], [], []>} : vector<256x128xf32>, vector<128x128xf32>, vector<256x128xf32> -> vector<256x128xf32>
    %c2 = arith.constant 2 : index
    %c0_14 = arith.constant 0 : index
    %17 = vector.load %arg5[%c2, %c0_14] : memref<3x128xf32, #tpu.memory_space<vmem>>, vector<1x128xf32>
    %18 = vector.broadcast %17 : vector<1x128xf32> to vector<256x128xf32>
    %19 = arith.addf %16, %18 : vector<256x128xf32>
    %20 = math.tanh %19 : vector<256x128xf32>
    %c0_15 = arith.constant 0 : index
    %c0_16 = arith.constant 0 : index
    %21 = vector.load %arg6[%c0_15, %c0_16] : memref<256x128xf32, #tpu.memory_space<vmem>>, vector<256x128xf32>
    tpu.vector_store %arg6[%c0_15, %c0_16], %20 {strides = array<i32>} : memref<256x128xf32, #tpu.memory_space<vmem>>, vector<256x128xf32>,
    return
  }
  func.func @transform_0(%arg0: i32) -> (i32, i32) {
    %c0_i32 = arith.constant 0 : i32
    %c0_i32_0 = arith.constant 0 : i32
    return %arg0, %c0_i32 : i32, i32
  }
  func.func @transform_1(%arg0: i32) -> (i32, i32) {
    %c0_i32 = arith.constant 0 : i32
    %c0_i32_0 = arith.constant 0 : i32
    %c0_i32_1 = arith.constant 0 : i32
    return %c0_i32, %c0_i32_0 : i32, i32
  }
  func.func @transform_2(%arg0: i32) -> (i32, i32) {
    %c0_i32 = arith.constant 0 : i32
    %c0_i32_0 = arith.constant 0 : i32
    %c0_i32_1 = arith.constant 0 : i32
    return %c0_i32, %c0_i32_0 : i32, i32
  }
  func.func @transform_3(%arg0: i32) -> (i32, i32) {
    %c0_i32 = arith.constant 0 : i32
    %c0_i32_0 = arith.constant 0 : i32
    %c0_i32_1 = arith.constant 0 : i32
    return %c0_i32, %c0_i32_0 : i32, i32
  }
  func.func @transform_4(%arg0: i32) -> (i32, i32) {
    %c0_i32 = arith.constant 0 : i32
    %c0_i32_0 = arith.constant 0 : i32
    %c0_i32_1 = arith.constant 0 : i32
    return %c0_i32, %c0_i32_0 : i32, i32
  }
  func.func @transform_5(%arg0: i32) -> (i32, i32) {
    %c0_i32 = arith.constant 0 : i32
    %c0_i32_0 = arith.constant 0 : i32
    return %arg0, %c0_i32 : i32, i32
  }
}

</mosaic_0001>

<bundles_post_ra>
// kernel: policy_forward.1
= control target key start
LH: loop header
LB: loop body
LE: loop exit
PB: predicated region body
PF: predicated region fallthrough
CT: control target
= control target key end

     0   :  { %s1989_s1 = inlined_call_operand.vmem [shape: f32[128,128], index: 1, kind: input, shape index: {}]   ;;  %s1990_s0 = inlined_call_operand.vmem [shape: f32[256,128], index: 0, kind: input, shape index: {}]   ;;  %s1991_s2 = inlined_call_operand.vmem [shape: f32[128,128], index: 2, kind: input, shape index: {}]   ;;  %s1992_s3 = inlined_call_operand.vmem [shape: f32[128,128], index: 3, kind: input, shape index: {}]   ;;  %s1993_s4 = inlined_call_operand.vmem [shape: f32[3,128], index: 4, kind: input, shape index: {}]   ;;  %s1994_s5 = inlined_call_operand.vmem [shape: f32[256,128], index: 5, kind: output, shape index: {}]  }
   0x1   :  { %v52_v0 = vld [vmem:[%s1989_s1] sm:$0xff]  ;;  %v53_v1 = vld [vmem:[%s1989_s1 + $0x8] sm:$0xff]  ;;  %v54_v2 = vld [vmem:[%s1989_s1 + $0x10] sm:$0xff] }
   0x2   :  { %v1309_v3 = vpack.c.bf16 %v53_v1, %v52_v0  ;;  %v55_v4 = vld [vmem:[%s1989_s1 + $0x18] sm:$0xff]  ;;  %v56_v6 = vld [vmem:[%s1989_s1 + $0x20] sm:$0xff]  ;;  %v57_v7 = vld [vmem:[%s1989_s1 + $0x28] sm:$0xff] }
   0x3   :  { %v1313_v5 = vpack.c.bf16 %v55_v4, %v54_v2  ;;  %v1317_v8 = vpack.c.bf16 %v57_v7, %v56_v6  ;;  %v20_v9 = vld [vmem:[%s1990_s0] sm:$0xff]  ;;  %v58_v10 = vld [vmem:[%s1989_s1 + $0x30] sm:$0xff]  ;;  %v59_v11 = vld [vmem:[%s1989_s1 + $0x38] sm:$0xff] }
   0x4   :  { %1310 = vmatprep.subr.bf16.mxu0 %v1309_v3  ;;  %1405 = vmatprep.subr.bf16.mxu1 %v1309_v3  ;;  %v1321_v12 = vpack.c.bf16 %v59_v11, %v58_v10  ;;  %v60_v13 = vld [vmem:[%s1989_s1 + $0x40] sm:$0xff]  ;;  %v61_v14 = vld [vmem:[%s1989_s1 + $0x48] sm:$0xff]  ;;  %v62_v17 = vld [vmem:[%s1989_s1 + $0x50] sm:$0xff] }
   0x5   :  { %1312 = vmatpush3.bf16.msra.mxu0 %v1309_v3  ;;  %1413 = vmatpush3.bf16.msra.mxu1 %v1309_v3  ;;  %v36_v15 = vld [vmem:[%s1990_s0 + $0x80] sm:$0xff]  ;;  %v1325_v16 = vpack.c.bf16 %v61_v14, %v60_v13  ;;  %v63_v18 = vld [vmem:[%s1989_s1 + $0x58] sm:$0xff]  ;;  %v65_v21 = vld [vmem:[%s1989_s1 + $0x68] sm:$0xff] }
   0x6   :  { %1314 = vmatprep.subr.bf16.mxu0 %v1313_v5  ;;  %1406 = vmatprep.subr.bf16.mxu1 %v1313_v5  ;;  %v1329_v19 = vpack.c.bf16 %v63_v18, %v62_v17  ;;  %v64_v20 = vld [vmem:[%s1989_s1 + $0x60] sm:$0xff]  ;;  %v66_v23 = vld [vmem:[%s1989_s1 + $0x70] sm:$0xff]  ;;  %v67_v24 = vld [vmem:[%s1989_s1 + $0x78] sm:$0xff] }
   0x7   :  { %1101 = vmatprep.mubr.f32.mxu0 %v20_v9  ;;  %1125 = vmatprep.mubr.f32.mxu1 %v36_v15  ;;  %v1333_v22 = vpack.c.bf16 %v65_v21, %v64_v20  ;;  %v1337_v25 = vpack.c.bf16 %v67_v24, %v66_v23  ;;  %v330_v26 = vld [vmem:[%s1991_s2] sm:$0xff]  ;;  %v331_v27 = vld [vmem:[%s1991_s2 + $0x8] sm:$0xff]  ;;  %v332_v29 = vld [vmem:[%s1991_s2 + $0x10] sm:$0xff] }
   0x8   :  { %v1341_v28 = vpack.c.bf16 %v331_v27, %v330_v26  ;;  %v333_v30 = vld [vmem:[%s1991_s2 + $0x18] sm:$0xff]  ;;  %v21_v31 = vld [vmem:[%s1990_s0 + $0x8] sm:$0xff]  ;;  %v22_v33 = vld [vmem:[%s1990_s0 + $0x10] sm:$0xff] }
   0x9   :  { %1316 = vmatpush3.bf16.msra.mxu0 %v1313_v5  ;;  %1414 = vmatpush3.bf16.msra.mxu1 %v1313_v5  ;;  %v37_v32 = vld [vmem:[%s1990_s0 + $0x88] sm:$0xff]  ;;  %v38_v34 = vld [vmem:[%s1990_s0 + $0x90] sm:$0xff]  ;;  %v1345_v35 = vpack.c.bf16 %v333_v30, %v332_v29  ;;  %v334_v36 = vld [vmem:[%s1991_s2 + $0x20] sm:$0xff] }
   0xa   :  { %1318 = vmatprep.subr.bf16.mxu0 %v1317_v8  ;;  %1407 = vmatprep.subr.bf16.mxu1 %v1317_v8  ;;  %v335_v37 = vld [vmem:[%s1991_s2 + $0x28] sm:$0xff]  ;;  %v23_v38 = vld [vmem:[%s1990_s0 + $0x18] sm:$0xff]  ;;  %v24_v40 = vld [vmem:[%s1990_s0 + $0x20] sm:$0xff] }
   0xb   :  { %v39_v39 = vld [vmem:[%s1990_s0 + $0x98] sm:$0xff]  ;;  %v40_v41 = vld [vmem:[%s1990_s0 + $0xa0] sm:$0xff]  ;;  %v1349_v42 = vpack.c.bf16 %v335_v37, %v334_v36  ;;  %v336_v43 = vld [vmem:[%s1991_s2 + $0x30] sm:$0xff] }
   0xc   :  { %v337_v44 = vld [vmem:[%s1991_s2 + $0x38] sm:$0xff]  ;;  %v25_v45 = vld [vmem:[%s1990_s0 + $0x28] sm:$0xff]  ;;  %v26_v47 = vld [vmem:[%s1990_s0 + $0x30] sm:$0xff] }
   0xd   :  { %1320 = vmatpush3.bf16.msra.mxu0 %v1317_v8  ;;  %1415 = vmatpush3.bf16.msra.mxu1 %v1317_v8  ;;  %v41_v46 = vld [vmem:[%s1990_s0 + $0xa8] sm:$0xff]  ;;  %v42_v48 = vld [vmem:[%s1990_s0 + $0xb0] sm:$0xff]  ;;  %v1353_v49 = vpack.c.bf16 %v337_v44, %v336_v43  ;;  %v338_v50 = vld [vmem:[%s1991_s2 + $0x40] sm:$0xff] }
   0xe   :  { %1322 = vmatprep.subr.bf16.mxu0 %v1321_v12  ;;  %1408 = vmatprep.subr.bf16.mxu1 %v1321_v12  ;;  %v339_v51 = vld [vmem:[%s1991_s2 + $0x48] sm:$0xff]  ;;  %v27_v52 = vld [vmem:[%s1990_s0 + $0x38] sm:$0xff]  ;;  %v28_v54 = vld [vmem:[%s1990_s0 + $0x40] sm:$0xff] }
   0xf   :  { %v43_v53 = vld [vmem:[%s1990_s0 + $0xb8] sm:$0xff]  ;;  %v44_v55 = vld [vmem:[%s1990_s0 + $0xc0] sm:$0xff]  ;;  %v1357_v56 = vpack.c.bf16 %v339_v51, %v338_v50  ;;  %v340_v57 = vld [vmem:[%s1991_s2 + $0x50] sm:$0xff] }
  0x10   :  { %v341_v58 = vld [vmem:[%s1991_s2 + $0x58] sm:$0xff]  ;;  %v29_v59 = vld [vmem:[%s1990_s0 + $0x48] sm:$0xff]  ;;  %v30_v61 = vld [vmem:[%s1990_s0 + $0x50] sm:$0xff] }
  0x11   :  { %1324 = vmatpush3.bf16.msra.mxu0 %v1321_v12  ;;  %1416 = vmatpush3.bf16.msra.mxu1 %v1321_v12  ;;  %v45_v60 = vld [vmem:[%s1990_s0 + $0xc8] sm:$0xff]  ;;  %v46_v62 = vld [vmem:[%s1990_s0 + $0xd0] sm:$0xff]  ;;  %v1361_v63 = vpack.c.bf16 %v341_v58, %v340_v57  ;;  %v342_v0 = vld [vmem:[%s1991_s2 + $0x60] sm:$0xff] }
  0x12   :  { %1326 = vmatprep.subr.bf16.mxu0 %v1325_v16  ;;  %1409 = vmatprep.subr.bf16.mxu1 %v1325_v16  ;;  %v343_v1 = vld [vmem:[%s1991_s2 + $0x68] sm:$0xff]  ;;  %v31_v2 = vld [vmem:[%s1990_s0 + $0x58] sm:$0xff]  ;;  %v32_v4 = vld [vmem:[%s1990_s0 + $0x60] sm:$0xff] }
  0x13   :  { %v47_v3 = vld [vmem:[%s1990_s0 + $0xd8] sm:$0xff]  ;;  %v48_v5 = vld [vmem:[%s1990_s0 + $0xe0] sm:$0xff]  ;;  %v1365_v6 = vpack.c.bf16 %v343_v1, %v342_v0  ;;  %v33_v7 = vld [vmem:[%s1990_s0 + $0x68] sm:$0xff] }
  0x14   :  { %v49_v8 = vld [vmem:[%s1990_s0 + $0xe8] sm:$0xff]  ;;  %v34_v9 = vld [vmem:[%s1990_s0 + $0x70] sm:$0xff]  ;;  %v35_v11 = vld [vmem:[%s1990_s0 + $0x78] sm:$0xff] }
  0x15   :  { %1328 = vmatpush3.bf16.msra.mxu0 %v1325_v16  ;;  %1417 = vmatpush3.bf16.msra.mxu1 %v1325_v16  ;;  %v50_v10 = vld [vmem:[%s1990_s0 + $0xf0] sm:$0xff]  ;;  %v51_v12 = vld [vmem:[%s1990_s0 + $0xf8] sm:$0xff]  ;;  %v608_v16 = vld [vmem:[%s1992_s3] sm:$0xff] }
  0x16   :  { %1330 = vmatprep.subr.bf16.mxu0 %v1329_v19  ;;  %1410 = vmatprep.subr.bf16.mxu1 %v1329_v19  ;;  %v344_v13 = vld [vmem:[%s1991_s2 + $0x70] sm:$0xff]  ;;  %v345_v14 = vld [vmem:[%s1991_s2 + $0x78] sm:$0xff]  ;;  %v609_v17 = vld [vmem:[%s1992_s3 + $0x8] sm:$0xff] }
  0x17   :  { %v1369_v15 = vpack.c.bf16 %v345_v14, %v344_v13  ;;  %v610_v18 = vld [vmem:[%s1992_s3 + $0x10] sm:$0xff]  ;;  %v611_v20 = vld [vmem:[%s1992_s3 + $0x18] sm:$0xff]  ;;  %v613_v23 = vld [vmem:[%s1992_s3 + $0x28] sm:$0xff] }
  0x18   :  { %v1377_v21 = vpack.c.bf16 %v611_v20, %v610_v18  ;;  %v615_v26 = vld [vmem:[%s1992_s3 + $0x38] sm:$0xff]  ;;  %v617_v29 = vld [vmem:[%s1992_s3 + $0x48] sm:$0xff]  ;;  %v1752_v37 = vld [vmem:[%s1993_s4] ss:$0 sm:$0xff] }
  0x19   :  { %1332 = vmatpush3.bf16.msra.mxu0 %v1329_v19  ;;  %1418 = vmatpush3.bf16.msra.mxu1 %v1329_v19  ;;  %v1373_v19 = vpack.c.bf16 %v609_v17, %v608_v16 }
  0x1a   :  { %1334 = vmatprep.subr.bf16.mxu0 %v1333_v22  ;;  %1411 = vmatprep.subr.bf16.mxu1 %v1333_v22 }
  0x1d   :  { %1336 = vmatpush3.bf16.msra.mxu0 %v1333_v22  ;;  %1419 = vmatpush3.bf16.msra.mxu1 %v1333_v22  ;;  %v612_v22 = vld [vmem:[%s1992_s3 + $0x20] sm:$0xff] }
  0x1e   :  { %1338 = vmatprep.subr.bf16.mxu0 %v1337_v25  ;;  %1412 = vmatprep.subr.bf16.mxu1 %v1337_v25  ;;  %v1381_v24 = vpack.c.bf16 %v613_v23, %v612_v22 }
  0x21   :  { %1340 = vmatpush3.bf16.msra.mxu0 %v1337_v25  ;;  %1420 = vmatpush3.bf16.msra.mxu1 %v1337_v25  ;;  %v614_v25 = vld [vmem:[%s1992_s3 + $0x30] sm:$0xff] }
  0x22   :  { %1342 = vmatprep.subr.bf16.mxu1 %v1341_v28  ;;  %1374 = vmatprep.subr.bf16.mxu0 %v1373_v19  ;;  %v1385_v27 = vpack.c.bf16 %v615_v26, %v614_v25 }
  0x24   :  { %1102 = vmatmul.mubr.f32.vlgmr.msra.gmra.mrb[0].mxu0 %v21_v31  ;;  %1126 = vmatmul.mubr.f32.vlgmr.msra.gmra.mrb[0].mxu1 %v37_v32  ;;  %v618_v31 = vld [vmem:[%s1992_s3 + $0x50] sm:$0xff]  ;;  %v619_v32 = vld [vmem:[%s1992_s3 + $0x58] sm:$0xff] }
  0x25   :  { %1104 = vmatprep.mubr.f32.mxu0 %v22_v33  ;;  %1128 = vmatprep.mubr.f32.mxu1 %v38_v34  ;;  %v1393_v33 = vpack.c.bf16 %v619_v32, %v618_v31  ;;  %v620_v34 = vld [vmem:[%s1992_s3 + $0x60] sm:$0xff] }
  0x26   :  { %1344 = vmatpush3.bf16.msra.mxu1 %v1341_v28  ;;  %1376 = vmatpush3.bf16.msra.mxu0 %v1373_v19  ;;  %v616_v28 = vld [vmem:[%s1992_s3 + $0x40] sm:$0xff] }
  0x27   :  { %1346 = vmatprep.subr.bf16.mxu1 %v1345_v35  ;;  %1378 = vmatprep.subr.bf16.mxu0 %v1377_v21  ;;  %v1389_v30 = vpack.c.bf16 %v617_v29, %v616_v28 }
  0x28   :  { %1105 = vmatmul.mubr.f32.gmra.mrb[2].mxu0 %v23_v38  ;;  %1129 = vmatmul.mubr.f32.gmra.mrb[2].mxu1 %v39_v39 }
  0x29   :  { %1107 = vmatprep.mubr.f32.mxu0 %v24_v40  ;;  %1131 = vmatprep.mubr.f32.mxu1 %v40_v41 }
  0x2a   :  { %1348 = vmatpush3.bf16.msra.mxu1 %v1345_v35  ;;  %1380 = vmatpush3.bf16.msra.mxu0 %v1377_v21  ;;  %v621_v35 = vld [vmem:[%s1992_s3 + $0x68] sm:$0xff] }
  0x2b   :  { %1350 = vmatprep.subr.bf16.mxu1 %v1349_v42  ;;  %1382 = vmatprep.subr.bf16.mxu0 %v1381_v24  ;;  %v1397_v36 = vpack.c.bf16 %v621_v35, %v620_v34 }
  0x2c   :  { %1108 = vmatmul.mubr.f32.gmra.mrb[4].mxu0 %v25_v45  ;;  %1132 = vmatmul.mubr.f32.gmra.mrb[4].mxu1 %v41_v46 }
  0x2d   :  { %1110 = vmatprep.mubr.f32.mxu0 %v26_v47  ;;  %1134 = vmatprep.mubr.f32.mxu1 %v42_v48 }
  0x2e   :  { %1352 = vmatpush3.bf16.msra.mxu1 %v1349_v42  ;;  %1384 = vmatpush3.bf16.msra.mxu0 %v1381_v24 }
  0x2f   :  { %1354 = vmatprep.subr.bf16.mxu1 %v1353_v49  ;;  %1386 = vmatprep.subr.bf16.mxu0 %v1385_v27 }
  0x30   :  { %1111 = vmatmul.mubr.f32.gmra.mrb[6].mxu0 %v27_v52  ;;  %1135 = vmatmul.mubr.f32.gmra.mrb[6].mxu1 %v43_v53 }
  0x31   :  { %1113 = vmatprep.mubr.f32.mxu0 %v28_v54  ;;  %1137 = vmatprep.mubr.f32.mxu1 %v44_v55 }
  0x32   :  { %1356 = vmatpush3.bf16.msra.mxu1 %v1353_v49  ;;  %1388 = vmatpush3.bf16.msra.mxu0 %v1385_v27 }
  0x33   :  { %1358 = vmatprep.subr.bf16.mxu1 %v1357_v56  ;;  %1390 = vmatprep.subr.bf16.mxu0 %v1389_v30 }
  0x34   :  { %1114 = vmatmul.mubr.f32.gmra.mrb[8].mxu0 %v29_v59  ;;  %1138 = vmatmul.mubr.f32.gmra.mrb[8].mxu1 %v45_v60 }
  0x35   :  { %1116 = vmatprep.mubr.f32.mxu0 %v30_v61  ;;  %1140 = vmatprep.mubr.f32.mxu1 %v46_v62 }
  0x36   :  { %1360 = vmatpush3.bf16.msra.mxu1 %v1357_v56  ;;  %1392 = vmatpush3.bf16.msra.mxu0 %v1389_v30 }
  0x37   :  { %1362 = vmatprep.subr.bf16.mxu1 %v1361_v63  ;;  %1394 = vmatprep.subr.bf16.mxu0 %v1393_v33 }
  0x38   :  { %1117 = vmatmul.mubr.f32.gmra.mrb[10].mxu0 %v31_v2  ;;  %1141 = vmatmul.mubr.f32.gmra.mrb[10].mxu1 %v47_v3 }
  0x39   :  { %1119 = vmatprep.mubr.f32.mxu0 %v32_v4  ;;  %1143 = vmatprep.mubr.f32.mxu1 %v48_v5 }
  0x3a   :  { %1364 = vmatpush3.bf16.msra.mxu1 %v1361_v63  ;;  %1396 = vmatpush3.bf16.msra.mxu0 %v1393_v33 }
  0x3b   :  { %1366 = vmatprep.subr.bf16.mxu1 %v1365_v6  ;;  %1398 = vmatprep.subr.bf16.mxu0 %v1397_v36 }
  0x3c   :  { %1120 = vmatmul.mubr.f32.gmra.mrb[12].mxu0 %v33_v7  ;;  %1144 = vmatmul.mubr.f32.gmra.mrb[12].mxu1 %v49_v8 }
  0x3d   :  { %1122 = vmatprep.mubr.f32.mxu0 %v34_v9  ;;  %1146 = vmatprep.mubr.f32.mxu1 %v50_v10 }
  0x3e   :  { %1368 = vmatpush3.bf16.msra.mxu1 %v1365_v6  ;;  %1400 = vmatpush3.bf16.msra.mxu0 %v1397_v36 }
  0x3f   :  { %1370 = vmatprep.subr.bf16.mxu1 %v1369_v15 }
  0x40   :  { %1123 = vmatmul.mubr.f32.gmra.mrb[14].mxu0 %v35_v11  ;;  %1147 = vmatmul.mubr.f32.gmra.mrb[14].mxu1 %v51_v12 }
  0x42   :  { %1372 = vmatpush3.bf16.msra.mxu1 %v1369_v15 }
  0xf7   :  { %v1103_v38 = vpop.f32.mrb[0].mxu0  ;;  %v1754_v39 = vpop.f32.mrb[0].mxu1 }
  0xf8   :  { %v145_v40 = vadd.f32 %v1103_v38, %v1752_v37  ;;  %v139_v41 = vpop.f32.mrb[1].mxu0  ;;  %v1757_v42 = vpop.f32.mrb[1].mxu1 }
  0xf9   :  { %v140_v43 = vadd.f32 %v1752_v37, %v139_v41  ;;  %v220_v30 = vadd.f32 %v1752_v37, %v1757_v42 }
  0xfa   :  { %v299_v47 = vmax.f32 %v145_v40, 0.0 }
  0xfb   :  { %v298_v44 = vmax.f32 %v140_v43, 0.0  ;;  %v1106_v45 = vpop.f32.mrb[2].mxu0  ;;  %v1760_v46 = vpop.f32.mrb[2].mxu1  ;;  %v314_v40 = vmax.f32 %v220_v30, 0.0 }
  0xfc   :  { %v155_v48 = vadd.f32 %v1106_v45, %v1752_v37  ;;  %v149_v49 = vpop.f32.mrb[3].mxu0  ;;  %v1763_v50 = vpop.f32.mrb[3].mxu1 }
  0xfd   :  { %v150_v51 = vadd.f32 %v1752_v37, %v149_v49  ;;  %1181 = vmatprep.mubr.f32.mxu1 %v298_v44  ;;  %v230_v41 = vadd.f32 %v1752_v37, %v1763_v50  ;;  %v225_v44 = vadd.f32 %v1754_v39, %v1752_v37 }
  0xfe   :  { %1182 = vmatmul.mubr.f32.vlgmr.msra.gmra.mrb[16].mxu1 %v299_v47  ;;  %v301_v55 = vmax.f32 %v155_v48, 0.0  ;;  %v235_v48 = vadd.f32 %v1760_v46, %v1752_v37 }
  0xff   :  { %v300_v52 = vmax.f32 %v150_v51, 0.0  ;;  %v1109_v53 = vpop.f32.mrb[4].mxu0  ;;  %v1766_v54 = vpop.f32.mrb[4].mxu1  ;;  %v316_v42 = vmax.f32 %v230_v41, 0.0  ;;  %v315_v47 = vmax.f32 %v225_v44, 0.0 }
 0x100   :  { %v165_v56 = vadd.f32 %v1109_v53, %v1752_v37  ;;  %v159_v57 = vpop.f32.mrb[5].mxu0  ;;  %v1769_v58 = vpop.f32.mrb[5].mxu1  ;;  %v317_v51 = vmax.f32 %v235_v48, 0.0  ;;  %v245_v39 = vadd.f32 %v1766_v54, %v1752_v37 }
 0x101   :  { %v160_v59 = vadd.f32 %v1752_v37, %v159_v57  ;;  %1184 = vmatprep.mubr.f32.mxu1 %v300_v52  ;;  %v240_v45 = vadd.f32 %v1752_v37, %v1769_v58 }
 0x102   :  { %1185 = vmatmul.mubr.f32.gmra.mrb[18].mxu1 %v301_v55  ;;  %v303_v63 = vmax.f32 %v165_v56, 0.0  ;;  %v319_v55 = vmax.f32 %v245_v39, 0.0 }
 0x103   :  { %v302_v60 = vmax.f32 %v160_v59, 0.0  ;;  %v1112_v61 = vpop.f32.mrb[6].mxu0  ;;  %v1772_v62 = vpop.f32.mrb[6].mxu1  ;;  %v318_v49 = vmax.f32 %v240_v45, 0.0 }
 0x104   :  { %v175_v0 = vadd.f32 %v1112_v61, %v1752_v37  ;;  %v169_v1 = vpop.f32.mrb[7].mxu0  ;;  %v249_v2 = vpop.f32.mrb[7].mxu1  ;;  %v255_v56 = vadd.f32 %v1772_v62, %v1752_v37 }
 0x105   :  { %v170_v3 = vadd.f32 %v1752_v37, %v169_v1  ;;  %1187 = vmatprep.mubr.f32.mxu1 %v302_v60  ;;  %v250_v50 = vadd.f32 %v1752_v37, %v249_v2 }
 0x106   :  { %1188 = vmatmul.mubr.f32.gmra.mrb[20].mxu1 %v303_v63  ;;  %v305_v7 = vmax.f32 %v175_v0, 0.0  ;;  %v321_v58 = vmax.f32 %v255_v56, 0.0 }
 0x107   :  { %v304_v4 = vmax.f32 %v170_v3, 0.0  ;;  %v1115_v5 = vpop.f32.mrb[8].mxu0  ;;  %v1776_v6 = vpop.f32.mrb[8].mxu1  ;;  %v320_v52 = vmax.f32 %v250_v50, 0.0 }
 0x108   :  { %v185_v8 = vadd.f32 %v1115_v5, %v1752_v37  ;;  %v179_v9 = vpop.f32.mrb[9].mxu0  ;;  %v259_v10 = vpop.f32.mrb[9].mxu1  ;;  %v265_v59 = vadd.f32 %v1776_v6, %v1752_v37 }
 0x109   :  { %v180_v11 = vadd.f32 %v1752_v37, %v179_v9  ;;  %1190 = vmatprep.mubr.f32.mxu1 %v304_v4  ;;  %v260_v53 = vadd.f32 %v1752_v37, %v259_v10  ;;  %v1822_v10 = vld [vmem:[%s1993_s4 + $0x1] ss:$0 sm:$0xff] }
 0x10a   :  { %1191 = vmatmul.mubr.f32.gmra.mrb[22].mxu1 %v305_v7  ;;  %v307_v15 = vmax.f32 %v185_v8, 0.0  ;;  %v323_v61 = vmax.f32 %v265_v59, 0.0  ;;  %v622_v7 = vld [vmem:[%s1992_s3 + $0x70] sm:$0xff]  ;;  %v623_v8 = vld [vmem:[%s1992_s3 + $0x78] sm:$0xff] }
 0x10b   :  { %v306_v12 = vmax.f32 %v180_v11, 0.0  ;;  %v1118_v13 = vpop.f32.mrb[10].mxu0  ;;  %v1780_v14 = vpop.f32.mrb[10].mxu1  ;;  %v322_v46 = vmax.f32 %v260_v53, 0.0  ;;  %v1401_v9 = vpack.c.bf16 %v623_v8, %v622_v7 }
 0x10c   :  { %v195_v16 = vadd.f32 %v1118_v13, %v1752_v37  ;;  %v189_v17 = vpop.f32.mrb[11].mxu0  ;;  %v269_v18 = vpop.f32.mrb[11].mxu1  ;;  %v275_v63 = vadd.f32 %v1780_v14, %v1752_v37 }
 0x10d   :  { %v190_v19 = vadd.f32 %v1752_v37, %v189_v17  ;;  %1193 = vmatprep.mubr.f32.mxu1 %v306_v12  ;;  %v270_v57 = vadd.f32 %v1752_v37, %v269_v18  ;;  %1402 = vmatprep.subr.bf16.mxu0 %v1401_v9 }
 0x10e   :  { %1194 = vmatmul.mubr.f32.gmra.mrb[24].mxu1 %v307_v15  ;;  %v309_v23 = vmax.f32 %v195_v16, 0.0  ;;  %v325_v1 = vmax.f32 %v275_v63, 0.0  ;;  %1404 = vmatpush3.bf16.msra.mxu0 %v1401_v9 }
 0x10f   :  { %v308_v20 = vmax.f32 %v190_v19, 0.0  ;;  %v1121_v21 = vpop.f32.mrb[12].mxu0  ;;  %v1145_v22 = vpop.f32.mrb[12].mxu1  ;;  %v324_v54 = vmax.f32 %v270_v57, 0.0 }
 0x110   :  { %v205_v24 = vadd.f32 %v1121_v21, %v1752_v37  ;;  %v199_v25 = vpop.f32.mrb[13].mxu0  ;;  %v279_v26 = vpop.f32.mrb[13].mxu1  ;;  %v285_v2 = vadd.f32 %v1145_v22, %v1752_v37 }
 0x111   :  { %v200_v27 = vadd.f32 %v1752_v37, %v199_v25  ;;  %1196 = vmatprep.mubr.f32.mxu1 %v308_v20  ;;  %v280_v60 = vadd.f32 %v1752_v37, %v279_v26 }
 0x112   :  { %1197 = vmatmul.mubr.f32.gmra.mrb[26].mxu1 %v309_v23  ;;  %v311_v32 = vmax.f32 %v205_v24, 0.0  ;;  %v327_v4 = vmax.f32 %v285_v2, 0.0 }
 0x113   :  { %v310_v28 = vmax.f32 %v200_v27, 0.0  ;;  %v1124_v29 = vpop.f32.mrb[14].mxu0  ;;  %v1148_v31 = vpop.f32.mrb[14].mxu1  ;;  %v326_v62 = vmax.f32 %v280_v60, 0.0 }
 0x114   :  { %v215_v33 = vadd.f32 %v1124_v29, %v1752_v37  ;;  %v209_v34 = vpop.f32.mrb[15].mxu0  ;;  %v289_v35 = vpop.f32.mrb[15].mxu1  ;;  %v295_v5 = vadd.f32 %v1148_v31, %v1752_v37 }
 0x115   :  { %v210_v36 = vadd.f32 %v1752_v37, %v209_v34  ;;  %1199 = vmatprep.mubr.f32.mxu1 %v310_v28  ;;  %v290_v0 = vadd.f32 %v1752_v37, %v289_v35 }
 0x116   :  { %1200 = vmatmul.mubr.f32.gmra.mrb[28].mxu1 %v311_v32  ;;  %v313_v43 = vmax.f32 %v215_v33, 0.0  ;;  %v329_v6 = vmax.f32 %v295_v5, 0.0 }
 0x117   :  { %v312_v38 = vmax.f32 %v210_v36, 0.0  ;;  %v328_v3 = vmax.f32 %v290_v0, 0.0 }
 0x119   :  { %1202 = vmatprep.mubr.f32.mxu1 %v312_v38 }
 0x11a   :  { %1203 = vmatmul.mubr.f32.gmra.mrb[30].mxu1 %v313_v43 }
 0x11b   :  { %1205 = vmatprep.mubr.f32.mxu1 %v314_v40 }
 0x11e   :  { %1206 = vmatmul.mubr.f32.gmra.mrb[32].mxu1 %v315_v47 }
 0x11f   :  { %1208 = vmatprep.mubr.f32.mxu1 %v316_v42 }
 0x122   :  { %1209 = vmatmul.mubr.f32.gmra.mrb[34].mxu1 %v317_v51 }
 0x123   :  { %1211 = vmatprep.mubr.f32.mxu1 %v318_v49 }
 0x126   :  { %1212 = vmatmul.mubr.f32.gmra.mrb[36].mxu1 %v319_v55 }
 0x127   :  { %1214 = vmatprep.mubr.f32.mxu1 %v320_v52 }
 0x12a   :  { %1215 = vmatmul.mubr.f32.gmra.mrb[38].mxu1 %v321_v58 }
 0x12b   :  { %1217 = vmatprep.mubr.f32.mxu1 %v322_v46 }
 0x12e   :  { %1218 = vmatmul.mubr.f32.gmra.mrb[40].mxu1 %v323_v61 }
 0x12f   :  { %1220 = vmatprep.mubr.f32.mxu1 %v324_v54 }
 0x132   :  { %1221 = vmatmul.mubr.f32.gmra.mrb[42].mxu1 %v325_v1 }
 0x133   :  { %1223 = vmatprep.mubr.f32.mxu1 %v326_v62 }
 0x136   :  { %1224 = vmatmul.mubr.f32.gmra.mrb[44].mxu1 %v327_v4 }
 0x137   :  { %1226 = vmatprep.mubr.f32.mxu1 %v328_v3 }
 0x13a   :  { %1227 = vmatmul.mubr.f32.gmra.mrb[46].mxu1 %v329_v6 }
 0x1d1   :  { %v1183_v37 = vpop.f32.mrb[16].mxu1 }
 0x1d2   :  { %v423_v11 = vadd.f32 %v1183_v37, %v1822_v10  ;;  %v417_v12 = vpop.f32.mrb[17].mxu1 }
 0x1d3   :  { %v418_v13 = vadd.f32 %v1822_v10, %v417_v12 }
 0x1d4   :  { %v577_v16 = vmax.f32 %v423_v11, 0.0 }
 0x1d5   :  { %v576_v14 = vmax.f32 %v418_v13, 0.0  ;;  %v1186_v15 = vpop.f32.mrb[18].mxu1 }
 0x1d6   :  { %v433_v17 = vadd.f32 %v1186_v15, %v1822_v10  ;;  %v427_v18 = vpop.f32.mrb[19].mxu1 }
 0x1d7   :  { %v428_v19 = vadd.f32 %v1822_v10, %v427_v18  ;;  %1261 = vmatprep.mubr.f32.mxu0 %v576_v14 }
 0x1d8   :  { %1262 = vmatmul.mubr.f32.vlgmr.msra.gmra.mrb[16].mxu0 %v577_v16  ;;  %v579_v22 = vmax.f32 %v433_v17, 0.0 }
 0x1d9   :  { %v578_v20 = vmax.f32 %v428_v19, 0.0  ;;  %v1189_v21 = vpop.f32.mrb[20].mxu1 }
 0x1da   :  { %v443_v23 = vadd.f32 %v1189_v21, %v1822_v10  ;;  %v437_v24 = vpop.f32.mrb[21].mxu1 }
 0x1db   :  { %v438_v25 = vadd.f32 %v1822_v10, %v437_v24  ;;  %1264 = vmatprep.mubr.f32.mxu0 %v578_v20 }
 0x1dc   :  { %1265 = vmatmul.mubr.f32.gmra.mrb[18].mxu0 %v579_v22  ;;  %v581_v28 = vmax.f32 %v443_v23, 0.0 }
 0x1dd   :  { %v580_v26 = vmax.f32 %v438_v25, 0.0  ;;  %v1192_v27 = vpop.f32.mrb[22].mxu1 }
 0x1de   :  { %v453_v29 = vadd.f32 %v1192_v27, %v1822_v10  ;;  %v447_v30 = vpop.f32.mrb[23].mxu1 }
 0x1df   :  { %v448_v31 = vadd.f32 %v1822_v10, %v447_v30  ;;  %1267 = vmatprep.mubr.f32.mxu0 %v580_v26 }
 0x1e0   :  { %1268 = vmatmul.mubr.f32.gmra.mrb[20].mxu0 %v581_v28  ;;  %v583_v34 = vmax.f32 %v453_v29, 0.0 }
 0x1e1   :  { %v582_v32 = vmax.f32 %v448_v31, 0.0  ;;  %v1195_v33 = vpop.f32.mrb[24].mxu1 }
 0x1e2   :  { %v463_v35 = vadd.f32 %v1195_v33, %v1822_v10  ;;  %v457_v36 = vpop.f32.mrb[25].mxu1 }
 0x1e3   :  { %v458_v38 = vadd.f32 %v1822_v10, %v457_v36  ;;  %1270 = vmatprep.mubr.f32.mxu0 %v582_v32 }
 0x1e4   :  { %1271 = vmatmul.mubr.f32.gmra.mrb[22].mxu0 %v583_v34  ;;  %v585_v43 = vmax.f32 %v463_v35, 0.0 }
 0x1e5   :  { %v584_v40 = vmax.f32 %v458_v38, 0.0  ;;  %v1198_v41 = vpop.f32.mrb[26].mxu1 }
 0x1e6   :  { %v473_v44 = vadd.f32 %v1198_v41, %v1822_v10  ;;  %v467_v42 = vpop.f32.mrb[27].mxu1 }
 0x1e7   :  { %v468_v45 = vadd.f32 %v1822_v10, %v467_v42  ;;  %1273 = vmatprep.mubr.f32.mxu0 %v584_v40 }
 0x1e8   :  { %1274 = vmatmul.mubr.f32.gmra.mrb[24].mxu0 %v585_v43  ;;  %v587_v49 = vmax.f32 %v473_v44, 0.0 }
 0x1e9   :  { %v586_v47 = vmax.f32 %v468_v45, 0.0  ;;  %v1201_v48 = vpop.f32.mrb[28].mxu1  ;;  %v1859_v45 = vld [vmem:[%s1993_s4 + $0x2] ss:$0 sm:$0xff] }
 0x1ea   :  { %v483_v50 = vadd.f32 %v1201_v48, %v1822_v10  ;;  %v477_v51 = vpop.f32.mrb[29].mxu1 }
 0x1eb   :  { %v478_v39 = vadd.f32 %v1822_v10, %v477_v51  ;;  %1276 = vmatprep.mubr.f32.mxu0 %v586_v47 }
 0x1ec   :  { %1277 = vmatmul.mubr.f32.gmra.mrb[26].mxu0 %v587_v49  ;;  %v589_v55 = vmax.f32 %v483_v50, 0.0 }
 0x1ed   :  { %v588_v52 = vmax.f32 %v478_v39, 0.0  ;;  %v1204_v53 = vpop.f32.mrb[30].mxu1 }
 0x1ee   :  { %v493_v56 = vadd.f32 %v1204_v53, %v1822_v10  ;;  %v487_v46 = vpop.f32.mrb[31].mxu1 }
 0x1ef   :  { %v488_v57 = vadd.f32 %v1822_v10, %v487_v46  ;;  %1279 = vmatprep.mubr.f32.mxu0 %v588_v52 }
 0x1f0   :  { %1280 = vmatmul.mubr.f32.gmra.mrb[28].mxu0 %v589_v55  ;;  %v591_v54 = vmax.f32 %v493_v56, 0.0 }
 0x1f1   :  { %v590_v58 = vmax.f32 %v488_v57, 0.0  ;;  %v1207_v59 = vpop.f32.mrb[32].mxu1 }
 0x1f2   :  { %v503_v60 = vadd.f32 %v1207_v59, %v1822_v10  ;;  %v497_v61 = vpop.f32.mrb[33].mxu1 }
 0x1f3   :  { %v498_v63 = vadd.f32 %v1822_v10, %v497_v61  ;;  %1282 = vmatprep.mubr.f32.mxu0 %v590_v58 }
 0x1f4   :  { %1283 = vmatmul.mubr.f32.gmra.mrb[30].mxu0 %v591_v54  ;;  %v593_v1 = vmax.f32 %v503_v60, 0.0 }
 0x1f5   :  { %v592_v62 = vmax.f32 %v498_v63, 0.0  ;;  %v1210_v0 = vpop.f32.mrb[34].mxu1 }
 0x1f6   :  { %v513_v2 = vadd.f32 %v1210_v0, %v1822_v10  ;;  %v507_v3 = vpop.f32.mrb[35].mxu1 }
 0x1f7   :  { %v508_v4 = vadd.f32 %v1822_v10, %v507_v3  ;;  %1285 = vmatprep.mubr.f32.mxu0 %v592_v62 }
 0x1f8   :  { %1286 = vmatmul.mubr.f32.gmra.mrb[32].mxu0 %v593_v1  ;;  %v595_v7 = vmax.f32 %v513_v2, 0.0 }
 0x1f9   :  { %v594_v5 = vmax.f32 %v508_v4, 0.0  ;;  %v1213_v6 = vpop.f32.mrb[36].mxu1 }
 0x1fa   :  { %v523_v8 = vadd.f32 %v1213_v6, %v1822_v10  ;;  %v517_v9 = vpop.f32.mrb[37].mxu1 }
 0x1fb   :  { %v518_v37 = vadd.f32 %v1822_v10, %v517_v9  ;;  %1288 = vmatprep.mubr.f32.mxu0 %v594_v5 }
 0x1fc   :  { %1289 = vmatmul.mubr.f32.gmra.mrb[34].mxu0 %v595_v7  ;;  %v597_v13 = vmax.f32 %v523_v8, 0.0 }
 0x1fd   :  { %v596_v11 = vmax.f32 %v518_v37, 0.0  ;;  %v1216_v12 = vpop.f32.mrb[38].mxu1 }
 0x1fe   :  { %v533_v14 = vadd.f32 %v1216_v12, %v1822_v10  ;;  %v527_v15 = vpop.f32.mrb[39].mxu1 }
 0x1ff   :  { %v528_v16 = vadd.f32 %v1822_v10, %v527_v15  ;;  %1291 = vmatprep.mubr.f32.mxu0 %v596_v11 }
 0x200   :  { %1292 = vmatmul.mubr.f32.gmra.mrb[36].mxu0 %v597_v13  ;;  %v599_v19 = vmax.f32 %v533_v14, 0.0 }
 0x201   :  { %v598_v17 = vmax.f32 %v528_v16, 0.0  ;;  %v1219_v18 = vpop.f32.mrb[40].mxu1 }
 0x202   :  { %v543_v20 = vadd.f32 %v1219_v18, %v1822_v10  ;;  %v537_v21 = vpop.f32.mrb[41].mxu1 }
 0x203   :  { %v538_v22 = vadd.f32 %v1822_v10, %v537_v21  ;;  %1294 = vmatprep.mubr.f32.mxu0 %v598_v17 }
 0x204   :  { %1295 = vmatmul.mubr.f32.gmra.mrb[38].mxu0 %v599_v19  ;;  %v601_v25 = vmax.f32 %v543_v20, 0.0 }
 0x205   :  { %v600_v23 = vmax.f32 %v538_v22, 0.0  ;;  %v1222_v24 = vpop.f32.mrb[42].mxu1 }
 0x206   :  { %v553_v26 = vadd.f32 %v1222_v24, %v1822_v10  ;;  %v547_v27 = vpop.f32.mrb[43].mxu1 }
 0x207   :  { %v548_v28 = vadd.f32 %v1822_v10, %v547_v27  ;;  %1297 = vmatprep.mubr.f32.mxu0 %v600_v23 }
 0x208   :  { %1298 = vmatmul.mubr.f32.gmra.mrb[40].mxu0 %v601_v25  ;;  %v603_v31 = vmax.f32 %v553_v26, 0.0 }
 0x209   :  { %v602_v29 = vmax.f32 %v548_v28, 0.0  ;;  %v1225_v30 = vpop.f32.mrb[44].mxu1 }
 0x20a   :  { %v563_v32 = vadd.f32 %v1225_v30, %v1822_v10  ;;  %v557_v33 = vpop.f32.mrb[45].mxu1 }
 0x20b   :  { %v558_v34 = vadd.f32 %v1822_v10, %v557_v33  ;;  %1300 = vmatprep.mubr.f32.mxu0 %v602_v29 }
 0x20c   :  { %1301 = vmatmul.mubr.f32.gmra.mrb[42].mxu0 %v603_v31  ;;  %v605_v38 = vmax.f32 %v563_v32, 0.0 }
 0x20d   :  { %v604_v35 = vmax.f32 %v558_v34, 0.0  ;;  %v1228_v36 = vpop.f32.mrb[46].mxu1 }
 0x20e   :  { %v573_v40 = vadd.f32 %v1228_v36, %v1822_v10  ;;  %v567_v41 = vpop.f32.mrb[47].mxu1 }
 0x20f   :  { %v568_v43 = vadd.f32 %v1822_v10, %v567_v41  ;;  %1303 = vmatprep.mubr.f32.mxu0 %v604_v35 }
 0x210   :  { %1304 = vmatmul.mubr.f32.gmra.mrb[44].mxu0 %v605_v38  ;;  %v607_v42 = vmax.f32 %v573_v40, 0.0 }
 0x211   :  { %v606_v44 = vmax.f32 %v568_v43, 0.0 }
 0x213   :  { %1306 = vmatprep.mubr.f32.mxu0 %v606_v44 }
 0x214   :  { %1307 = vmatmul.mubr.f32.gmra.mrb[46].mxu0 %v607_v42 }
 0x2ab   :  { %v1263_v47 = vpop.f32.mrb[16].mxu0 }
 0x2ac   :  { %v701_v48 = vadd.f32 %v1263_v47, %v1859_v45  ;;  %v695_v49 = vpop.f32.mrb[17].mxu0 }
 0x2ad   :  { %v696_v50 = vadd.f32 %v1859_v45, %v695_v49 }
 0x2ae   :  { %1421 = vtanh.f32 %v701_v48 }
 0x2af   :  { %1423 = vtanh.f32 %v696_v50  ;;  %v1266_v10 = vpop.f32.mrb[18].mxu0 }
 0x2b0   :  { %v711_v51 = vadd.f32 %v1266_v10, %v1859_v45  ;;  %v705_v39 = vpop.f32.mrb[19].mxu0 }
 0x2b1   :  { %v706_v52 = vadd.f32 %v1859_v45, %v705_v39 }
 0x2b2   :  { %1425 = vtanh.f32 %v711_v51 }
 0x2b3   :  { %1427 = vtanh.f32 %v706_v52  ;;  %v1269_v53 = vpop.f32.mrb[20].mxu0 }
 0x2b4   :  { %v721_v55 = vadd.f32 %v1269_v53, %v1859_v45  ;;  %v715_v56 = vpop.f32.mrb[21].mxu0 }
 0x2b5   :  { %v716_v46 = vadd.f32 %v1859_v45, %v715_v56 }
 0x2b6   :  { %1429 = vtanh.f32 %v721_v55 }
 0x2b7   :  { %1431 = vtanh.f32 %v716_v46  ;;  %v1272_v57 = vpop.f32.mrb[22].mxu0 }
 0x2b8   :  { %v1422_v58 = vpop.eup %1421  ;;  %v731_v59 = vadd.f32 %v1272_v57, %v1859_v45  ;;  %v725_v54 = vpop.f32.mrb[23].mxu0 }
 0x2b9   :  { %v1424_v60 = vpop.eup %1423  ;;  %887 = vst [vmem:[%s1994_s5 + $0x8] sm:$0xff] %v1422_v58  ;;  %v726_v61 = vadd.f32 %v1859_v45, %v725_v54 }
 0x2ba   :  { %886 = vst [vmem:[%s1994_s5] sm:$0xff] %v1424_v60  ;;  %1433 = vtanh.f32 %v731_v59 }
 0x2bb   :  { %1435 = vtanh.f32 %v726_v61  ;;  %v1275_v63 = vpop.f32.mrb[24].mxu0 }
 0x2bc   :  { %v1426_v62 = vpop.eup %1425  ;;  %v741_v0 = vadd.f32 %v1275_v63, %v1859_v45  ;;  %v735_v1 = vpop.f32.mrb[25].mxu0 }
 0x2bd   :  { %v1428_v2 = vpop.eup %1427  ;;  %889 = vst [vmem:[%s1994_s5 + $0x18] sm:$0xff] %v1426_v62  ;;  %v736_v3 = vadd.f32 %v1859_v45, %v735_v1 }
 0x2be   :  { %888 = vst [vmem:[%s1994_s5 + $0x10] sm:$0xff] %v1428_v2  ;;  %1437 = vtanh.f32 %v741_v0 }
 0x2bf   :  { %1439 = vtanh.f32 %v736_v3  ;;  %v1278_v4 = vpop.f32.mrb[26].mxu0 }
 0x2c0   :  { %v1430_v5 = vpop.eup %1429  ;;  %v751_v6 = vadd.f32 %v1278_v4, %v1859_v45  ;;  %v745_v7 = vpop.f32.mrb[27].mxu0 }
 0x2c1   :  { %v1432_v8 = vpop.eup %1431  ;;  %891 = vst [vmem:[%s1994_s5 + $0x28] sm:$0xff] %v1430_v5  ;;  %v746_v9 = vadd.f32 %v1859_v45, %v745_v7 }
 0x2c2   :  { %890 = vst [vmem:[%s1994_s5 + $0x20] sm:$0xff] %v1432_v8  ;;  %1441 = vtanh.f32 %v751_v6 }
 0x2c3   :  { %1443 = vtanh.f32 %v746_v9  ;;  %v1281_v37 = vpop.f32.mrb[28].mxu0 }
 0x2c4   :  { %v1434_v11 = vpop.eup %1433  ;;  %v761_v12 = vadd.f32 %v1281_v37, %v1859_v45  ;;  %v755_v13 = vpop.f32.mrb[29].mxu0 }
 0x2c5   :  { %v1436_v14 = vpop.eup %1435  ;;  %893 = vst [vmem:[%s1994_s5 + $0x38] sm:$0xff] %v1434_v11  ;;  %v756_v15 = vadd.f32 %v1859_v45, %v755_v13 }
 0x2c6   :  { %892 = vst [vmem:[%s1994_s5 + $0x30] sm:$0xff] %v1436_v14  ;;  %1445 = vtanh.f32 %v761_v12 }
 0x2c7   :  { %1447 = vtanh.f32 %v756_v15  ;;  %v1284_v16 = vpop.f32.mrb[30].mxu0 }
 0x2c8   :  { %v1438_v17 = vpop.eup %1437  ;;  %v771_v18 = vadd.f32 %v1284_v16, %v1859_v45  ;;  %v765_v19 = vpop.f32.mrb[31].mxu0 }
 0x2c9   :  { %v1440_v20 = vpop.eup %1439  ;;  %895 = vst [vmem:[%s1994_s5 + $0x48] sm:$0xff] %v1438_v17  ;;  %v766_v21 = vadd.f32 %v1859_v45, %v765_v19 }
 0x2ca   :  { %894 = vst [vmem:[%s1994_s5 + $0x40] sm:$0xff] %v1440_v20  ;;  %1449 = vtanh.f32 %v771_v18 }
 0x2cb   :  { %1451 = vtanh.f32 %v766_v21  ;;  %v1287_v22 = vpop.f32.mrb[32].mxu0 }
 0x2cc   :  { %v1442_v23 = vpop.eup %1441  ;;  %v781_v24 = vadd.f32 %v1287_v22, %v1859_v45  ;;  %v775_v25 = vpop.f32.mrb[33].mxu0 }
 0x2cd   :  { %v1444_v26 = vpop.eup %1443  ;;  %897 = vst [vmem:[%s1994_s5 + $0x58] sm:$0xff] %v1442_v23  ;;  %v776_v27 = vadd.f32 %v1859_v45, %v775_v25 }
 0x2ce   :  { %896 = vst [vmem:[%s1994_s5 + $0x50] sm:$0xff] %v1444_v26  ;;  %1453 = vtanh.f32 %v781_v24 }
 0x2cf   :  { %1455 = vtanh.f32 %v776_v27  ;;  %v1290_v28 = vpop.f32.mrb[34].mxu0 }
 0x2d0   :  { %v1446_v29 = vpop.eup %1445  ;;  %v791_v30 = vadd.f32 %v1290_v28, %v1859_v45  ;;  %v785_v31 = vpop.f32.mrb[35].mxu0 }
 0x2d1   :  { %v1448_v32 = vpop.eup %1447  ;;  %899 = vst [vmem:[%s1994_s5 + $0x68] sm:$0xff] %v1446_v29  ;;  %v786_v33 = vadd.f32 %v1859_v45, %v785_v31 }
 0x2d2   :  { %898 = vst [vmem:[%s1994_s5 + $0x60] sm:$0xff] %v1448_v32  ;;  %1457 = vtanh.f32 %v791_v30 }
 0x2d3   :  { %1459 = vtanh.f32 %v786_v33  ;;  %v1293_v34 = vpop.f32.mrb[36].mxu0 }
 0x2d4   :  { %v1450_v35 = vpop.eup %1449  ;;  %v801_v36 = vadd.f32 %v1293_v34, %v1859_v45  ;;  %v795_v38 = vpop.f32.mrb[37].mxu0 }
 0x2d5   :  { %v1452_v40 = vpop.eup %1451  ;;  %901 = vst [vmem:[%s1994_s5 + $0x78] sm:$0xff] %v1450_v35  ;;  %v796_v41 = vadd.f32 %v1859_v45, %v795_v38 }
 0x2d6   :  { %900 = vst [vmem:[%s1994_s5 + $0x70] sm:$0xff] %v1452_v40  ;;  %1461 = vtanh.f32 %v801_v36 }
 0x2d7   :  { %1463 = vtanh.f32 %v796_v41  ;;  %v1296_v43 = vpop.f32.mrb[38].mxu0 }
 0x2d8   :  { %v1454_v44 = vpop.eup %1453  ;;  %v811_v42 = vadd.f32 %v1296_v43, %v1859_v45  ;;  %v805_v47 = vpop.f32.mrb[39].mxu0 }
 0x2d9   :  { %v1456_v48 = vpop.eup %1455  ;;  %903 = vst [vmem:[%s1994_s5 + $0x88] sm:$0xff] %v1454_v44  ;;  %v806_v49 = vadd.f32 %v1859_v45, %v805_v47 }
 0x2da   :  { %902 = vst [vmem:[%s1994_s5 + $0x80] sm:$0xff] %v1456_v48  ;;  %1465 = vtanh.f32 %v811_v42 }
 0x2db   :  { %1467 = vtanh.f32 %v806_v49  ;;  %v1299_v50 = vpop.f32.mrb[40].mxu0 }
 0x2dc   :  { %v1458_v10 = vpop.eup %1457  ;;  %v821_v51 = vadd.f32 %v1299_v50, %v1859_v45  ;;  %v815_v39 = vpop.f32.mrb[41].mxu0 }
 0x2dd   :  { %v1460_v52 = vpop.eup %1459  ;;  %905 = vst [vmem:[%s1994_s5 + $0x98] sm:$0xff] %v1458_v10  ;;  %v816_v53 = vadd.f32 %v1859_v45, %v815_v39 }
 0x2de   :  { %904 = vst [vmem:[%s1994_s5 + $0x90] sm:$0xff] %v1460_v52  ;;  %1469 = vtanh.f32 %v821_v51 }
 0x2df   :  { %1471 = vtanh.f32 %v816_v53  ;;  %v1302_v55 = vpop.f32.mrb[42].mxu0 }
 0x2e0   :  { %v1462_v56 = vpop.eup %1461  ;;  %v831_v46 = vadd.f32 %v1302_v55, %v1859_v45  ;;  %v825_v57 = vpop.f32.mrb[43].mxu0 }
 0x2e1   :  { %v1464_v58 = vpop.eup %1463  ;;  %907 = vst [vmem:[%s1994_s5 + $0xa8] sm:$0xff] %v1462_v56  ;;  %v826_v59 = vadd.f32 %v1859_v45, %v825_v57 }
 0x2e2   :  { %906 = vst [vmem:[%s1994_s5 + $0xa0] sm:$0xff] %v1464_v58  ;;  %1473 = vtanh.f32 %v831_v46 }
 0x2e3   :  { %1475 = vtanh.f32 %v826_v59  ;;  %v1305_v54 = vpop.f32.mrb[44].mxu0 }
 0x2e4   :  { %v1466_v60 = vpop.eup %1465  ;;  %v841_v61 = vadd.f32 %v1305_v54, %v1859_v45  ;;  %v835_v63 = vpop.f32.mrb[45].mxu0 }
 0x2e5   :  { %v1468_v62 = vpop.eup %1467  ;;  %909 = vst [vmem:[%s1994_s5 + $0xb8] sm:$0xff] %v1466_v60  ;;  %v836_v0 = vadd.f32 %v1859_v45, %v835_v63 }
 0x2e6   :  { %908 = vst [vmem:[%s1994_s5 + $0xb0] sm:$0xff] %v1468_v62  ;;  %1477 = vtanh.f32 %v841_v61 }
 0x2e7   :  { %1479 = vtanh.f32 %v836_v0  ;;  %v1308_v1 = vpop.f32.mrb[46].mxu0 }
 0x2e8   :  { %v1470_v2 = vpop.eup %1469  ;;  %v851_v3 = vadd.f32 %v1308_v1, %v1859_v45  ;;  %v845_v4 = vpop.f32.mrb[47].mxu0 }
 0x2e9   :  { %v1472_v5 = vpop.eup %1471  ;;  %911 = vst [vmem:[%s1994_s5 + $0xc8] sm:$0xff] %v1470_v2  ;;  %v846_v6 = vadd.f32 %v1859_v45, %v845_v4 }
 0x2ea   :  { %910 = vst [vmem:[%s1994_s5 + $0xc0] sm:$0xff] %v1472_v5  ;;  %1481 = vtanh.f32 %v851_v3 }
 0x2eb   :  { %1483 = vtanh.f32 %v846_v6 }
 0x2ec   :  { %v1474_v7 = vpop.eup %1473 }
 0x2ed   :  { %v1476_v8 = vpop.eup %1475  ;;  %913 = vst [vmem:[%s1994_s5 + $0xd8] sm:$0xff] %v1474_v7 }
 0x2ee   :  { %912 = vst [vmem:[%s1994_s5 + $0xd0] sm:$0xff] %v1476_v8 }
 0x2f0   :  { %v1478_v9 = vpop.eup %1477 }
 0x2f1   :  { %v1480_v37 = vpop.eup %1479  ;;  %915 = vst [vmem:[%s1994_s5 + $0xe8] sm:$0xff] %v1478_v9 }
 0x2f2   :  { %914 = vst [vmem:[%s1994_s5 + $0xe0] sm:$0xff] %v1480_v37 }
 0x2f4   :  { %v1482_v45 = vpop.eup %1481 }
 0x2f5   :  { %v1484_v11 = vpop.eup %1483  ;;  %917 = vst [vmem:[%s1994_s5 + $0xf8] sm:$0xff] %v1482_v45 }
 0x2f6   :  { %916 = vst [vmem:[%s1994_s5 + $0xf0] sm:$0xff] %v1484_v11 }

</bundles_post_ra>
